<compile_context>
chip_gen: v7x
topology: tpu7x:2x2x1
jax: 0.10.0
libtpu: 0.0.40
codegen_flags: <defaults>
</compile_context>

<pallas_src>
import functools

import jax
import jax.numpy as jnp
from jax import lax
from jax.experimental import pallas as pl
from jax.experimental.pallas import tpu as pltpu


# ---------------------------------------------------------------------------
# Fused kernel: input projection + serial tanh recurrence + final projection
#   h_t = tanh(x_t @ W_in + b_in + h_{t-1} @ Whh)
#   out = h_T @ Wout + b_out        (emitted on the last time block)
# ---------------------------------------------------------------------------
def _fused_rnn_kernel(x_ref,      # (T_blk, B_tile, D_in)  time-major input block
                      win_ref,    # (D_in, H)   composed We^T @ Wih^T  (VMEM-resident)
                      bin_ref,    # (1, H)      composed b_e@Wih^T + b_ih + b_hh
                      whh_ref,    # (H, H)      Whh^T
                      wout_ref,   # (H, O)      Wout^T
                      bout_ref,   # (1, O)
                      out_ref,    # (B_tile, O)
                      h_scratch,  # (B_tile, H) VMEM, persists across time blocks
                      *, t_blk):
    tb = pl.program_id(1)

    @pl.when(tb == 0)
    def _():
        h_scratch[...] = jnp.zeros_like(h_scratch)

    # Hoist weight loads out of the unrolled time loop.
    w_in = win_ref[...]
    b_in = bin_ref[...]
    whh = whh_ref[...]

    def step(t, h):
        # z_t is independent of h -> its MXU work overlaps the serial h-chain.
        z_t = jnp.dot(x_ref[t], w_in, preferred_element_type=jnp.float32) + b_in
        return jnp.tanh(z_t + jnp.dot(h, whh, preferred_element_type=jnp.float32))

    h = lax.fori_loop(0, t_blk, step, h_scratch[...], unroll=True)
    h_scratch[...] = h

    @pl.when(tb == pl.num_programs(1) - 1)
    def _():
        out_ref[...] = (jnp.dot(h, wout_ref[...],
                                preferred_element_type=jnp.float32)
                        + bout_ref[...]).astype(out_ref.dtype)


# ---------------------------------------------------------------------------
# Wrapper
# ---------------------------------------------------------------------------
def _round_up(n, m):
    return ((n + m - 1) // m) * m


def _largest_divisor_leq(n, cap):
    for c in range(min(n, cap), 0, -1):
        if n % c == 0:
            return c
    return 1


def attention_rnn_forward(x, params, *, input_dim):
    """x: any shape (B, ...) that flattens to (B, T, input_dim)."""
    B = x.shape[0]
    x = x.reshape(B, -1, input_dim).astype(jnp.float32)   # PyTorch x.view(B,-1,D)
    T = x.shape[1]

    H = params["W_hh"].shape[0]
    O = params["W_out"].shape[0]

    if T == 0:
        # h_n stays at h0 = 0  ->  out = b_out  (edge case: avoid empty grid)
        return jnp.broadcast_to(params["b_out"][None, :], (B, O))

    # ---- tiling choices --------------------------------------------------
    B_pad = _round_up(B, 8)                        # f32 sublane minimum
    B_tile = min(B_pad, 128)                       # MXU-friendly batch tile
    B_pad = _round_up(B_pad, B_tile)
    # Time steps per grid iteration (unrolled in-kernel); cap bounds unroll
    # size / compile time while amortizing per-grid-step overhead (~0.35 us).
    T_blk = _largest_divisor_leq(T, 32)
    # Note: block sizes here are small; for large D_in/H/T re-derive against
    # the 64 MiB VMEM budget on v7x and set vmem_limit_bytes explicitly.

    # ---- operand prep (composed weights, folded biases) --------------------
    x_tm = jnp.transpose(x, (1, 0, 2))                        # (T, B, D_in)
    x_tm = jnp.pad(x_tm, ((0, 0), (0, B_pad - B), (0, 0)))    # (T, B_pad, D_in)

    hi = lax.Precision.HIGHEST
    # Exact composition of embedding and RNN input projection:
    #   (x @ We^T + b_e) @ Wih^T + b_ih + b_hh == x @ W_in + b_in
    w_in = jnp.dot(params["W_emb"].T, params["W_ih"].T, precision=hi)   # (D_in, H)
    b_in = (jnp.dot(params["b_emb"], params["W_ih"].T, precision=hi)
            + params["b_ih"] + params["b_hh"])[None, :]                 # (1, H)
    whh_t = params["W_hh"].T                    # (H, H)
    wout_t = params["W_out"].T                  # (H, O)
    bout = params["b_out"][None, :]             # (1, O)

    def vmem_resident():
        # Whole-array, single-buffered VMEM operand (weights never change block).
        return pl.BlockSpec(memory_space=pltpu.MemorySpace.VMEM)

    nb = B_pad // B_tile
    nt = T // T_blk

    out_pad = pl.pallas_call(
        functools.partial(_fused_rnn_kernel, t_blk=T_blk),
        out_shape=jax.ShapeDtypeStruct((B_pad, O), jnp.float32),
        grid_spec=pltpu.PrefetchScalarGridSpec(
            num_scalar_prefetch=0,
            grid=(nb, nt),
            in_specs=[
                pl.BlockSpec((T_blk, B_tile, input_dim), lambda b, tb: (tb, b, 0)),
                vmem_resident(),   # W_in
                vmem_resident(),   # b_in
                vmem_resident(),   # Whh
                vmem_resident(),   # Wout
                vmem_resident(),   # b_out
            ],
            out_specs=pl.BlockSpec((B_tile, O), lambda b, tb: (b, 0)),
            scratch_shapes=[pltpu.VMEM((B_tile, H), jnp.float32)],
        ),
        compiler_params=pltpu.CompilerParams(
            dimension_semantics=("parallel", "arbitrary")),
    )(x_tm, w_in, b_in, whh_t, wout_t, bout)

    return out_pad[:B]


# ---------------------------------------------------------------------------
# Params / reference / test
# ---------------------------------------------------------------------------
def init_params(key, input_dim, embed_size, hidden_dim, output_dim):
    ks = jax.random.split(key, 8)
    scale = 0.1
    return {
        "W_emb": scale * jax.random.normal(ks[0], (embed_size, input_dim), jnp.float32),
        "b_emb": scale * jax.random.normal(ks[1], (embed_size,), jnp.float32),
        "W_ih":  scale * jax.random.normal(ks[2], (hidden_dim, embed_size), jnp.float32),
        "b_ih":  scale * jax.random.normal(ks[3], (hidden_dim,), jnp.float32),
        "W_hh":  scale * jax.random.normal(ks[4], (hidden_dim, hidden_dim), jnp.float32),
        "b_hh":  scale * jax.random.normal(ks[5], (hidden_dim,), jnp.float32),
        "W_out": scale * jax.random.normal(ks[6], (output_dim, hidden_dim), jnp.float32),
        "b_out": scale * jax.random.normal(ks[7], (output_dim,), jnp.float32),
    }


def reference_forward(x, params, *, input_dim):
    """Pure-JAX reference mirroring the PyTorch module step-by-step."""
    B = x.shape[0]
    x = x.reshape(B, -1, input_dim)
    emb = x @ params["W_emb"].T + params["b_emb"]          # (B, T, E)
    H = params["W_hh"].shape[0]
    h = jnp.zeros((B, H), jnp.float32)
    for t in range(emb.shape[1]):
        h = jnp.tanh(emb[:, t] @ params["W_ih"].T + params["b_ih"]
                     + h @ params["W_hh"].T + params["b_hh"])
    return h @ params["W_out"].T + params["b_out"]


if __name__ == "__main__":
    key = jax.random.PRNGKey(0)
    kx, kp = jax.random.split(key)

    input_dim, embed_size, hidden_dim, output_dim = 16, 32, 32, 8
    B = 2
    # x is (B, 4, 32): the module's x.view(B, -1, input_dim) flattens it to
    # (B, T=8, input_dim=16).
    x = jax.random.normal(kx, (B, 4, 32), jnp.float32)
    params = init_params(kp, input_dim, embed_size, hidden_dim, output_dim)

    out = attention_rnn_forward(x, params, input_dim=input_dim)
    out = jax.block_until_ready(out)

    ref = reference_forward(x, params, input_dim=input_dim)
    assert out.shape == (B, output_dim)
    # Tolerance accounts for f32 MXU-vs-XLA matmul precision and the exact
    # algebraic re-association of the embedding / input-projection matmuls.
    assert jnp.allclose(out, ref, atol=2e-4, rtol=2e-4), (out, ref)

    print("KERNEL_OK")
</pallas_src>

<mosaic_0001>
module attributes {stable_mosaic.version = 11 : i64} {
  func.func @_fused_rnn_kernel(%arg0: i32, %arg1: i32, %arg2: memref<8x8x16xf32, #tpu.memory_space<vmem>>, %arg3: memref<16x32xf32, #tpu.memory_space<vmem>>, %arg4: memref<1x32xf32, #tpu.memory_space<vmem>>, %arg5: memref<32x32xf32, #tpu.memory_space<vmem>>, %arg6: memref<32x8xf32, #tpu.memory_space<vmem>>, %arg7: memref<1x8xf32, #tpu.memory_space<vmem>>, %arg8: memref<8x8xf32, #tpu.memory_space<vmem>>, %arg9: memref<8x32xf32, #tpu.memory_space<vmem>>) attributes {dimension_semantics = [#tpu.dimension_semantics<parallel>, #tpu.dimension_semantics<arbitrary>], iteration_bounds = array<i64: 1, 1>, scalar_prefetch = 0 : i64, scratch_operands = 1 : i64, tpu.core_type = #tpu.core_type<tc>, window_params = [{transform_indices = @transform_0, window_bounds = array<i64: 8, 8, 16>}, {pipeline_mode = #tpu.pipeline_mode<synchronous>, transform_indices = @transform_1, window_bounds = array<i64: 16, 32>}, {pipeline_mode = #tpu.pipeline_mode<synchronous>, transform_indices = @transform_2, window_bounds = array<i64: 1, 32>}, {pipeline_mode = #tpu.pipeline_mode<synchronous>, transform_indices = @transform_3, window_bounds = array<i64: 32, 32>}, {pipeline_mode = #tpu.pipeline_mode<synchronous>, transform_indices = @transform_4, window_bounds = array<i64: 32, 8>}, {pipeline_mode = #tpu.pipeline_mode<synchronous>, transform_indices = @transform_5, window_bounds = array<i64: 1, 8>}, {transform_indices = @transform_6, window_bounds = array<i64: 8, 8>}]} {
    %c0_i32 = arith.constant 0 : i32
    %0 = arith.cmpi eq, %arg1, %c0_i32 : i32
    %1 = arith.extui %0 : i1 to i32
    %c0_i32_0 = arith.constant 0 : i32
    %2 = arith.cmpi ne, %1, %c0_i32_0 : i32
    scf.if %2 {
      %cst_44 = arith.constant 0.000000e+00 : f32
      %83 = vector.broadcast %cst_44 : f32 to vector<8x32xf32>
      %c0_45 = arith.constant 0 : index
      %c0_46 = arith.constant 0 : index
      %84 = vector.load %arg9[%c0_45, %c0_46] : memref<8x32xf32, #tpu.memory_space<vmem>>, vector<8x32xf32>
      tpu.vector_store %arg9[%c0_45, %c0_46], %83 {strides = array<i32>} : memref<8x32xf32, #tpu.memory_space<vmem>>, vector<8x32xf32>,
    } else {
    }
    %c0 = arith.constant 0 : index
    %c0_1 = arith.constant 0 : index
    %3 = vector.load %arg3[%c0, %c0_1] : memref<16x32xf32, #tpu.memory_space<vmem>>, vector<16x32xf32>
    %c0_2 = arith.constant 0 : index
    %c0_3 = arith.constant 0 : index
    %4 = vector.load %arg4[%c0_2, %c0_3] : memref<1x32xf32, #tpu.memory_space<vmem>>, vector<1x32xf32>
    %c0_4 = arith.constant 0 : index
    %c0_5 = arith.constant 0 : index
    %5 = vector.load %arg5[%c0_4, %c0_5] : memref<32x32xf32, #tpu.memory_space<vmem>>, vector<32x32xf32>
    %c0_6 = arith.constant 0 : index
    %c0_7 = arith.constant 0 : index
    %6 = vector.load %arg9[%c0_6, %c0_7] : memref<8x32xf32, #tpu.memory_space<vmem>>, vector<8x32xf32>
    %c0_i32_8 = arith.constant 0 : i32
    %7 = arith.index_cast %c0_i32_8 : i32 to index
    %c0_9 = arith.constant 0 : index
    %c0_10 = arith.constant 0 : index
    %8 = vector.load %arg2[%7, %c0_9, %c0_10] : memref<8x8x16xf32, #tpu.memory_space<vmem>>, vector<1x8x16xf32>
    %9 = vector.shape_cast %8 : vector<1x8x16xf32> to vector<8x16xf32>
    %cst = arith.constant dense<0.000000e+00> : vector<8x32xf32>
    %10 = tpu.matmul %9, %3, %cst {dimension_numbers = #tpu.dot_dimension_numbers<[1], [0], [0], [1], [0, 0, 1, 1], [], []>} : vector<8x16xf32>, vector<16x32xf32>, vector<8x32xf32> -> vector<8x32xf32>
    %11 = vector.broadcast %4 : vector<1x32xf32> to vector<8x32xf32>
    %12 = arith.addf %10, %11 : vector<8x32xf32>
    %cst_11 = arith.constant dense<0.000000e+00> : vector<8x32xf32>
    %13 = tpu.matmul %6, %5, %cst_11 {dimension_numbers = #tpu.dot_dimension_numbers<[1], [0], [0], [1], [0, 0, 1, 1], [], []>} : vector<8x32xf32>, vector<32x32xf32>, vector<8x32xf32> -> vector<8x32xf32>
    %14 = arith.addf %12, %13 : vector<8x32xf32>
    %15 = math.tanh %14 : vector<8x32xf32>
    %c1_i32 = arith.constant 1 : i32
    %16 = arith.index_cast %c1_i32 : i32 to index
    %c0_12 = arith.constant 0 : index
    %c0_13 = arith.constant 0 : index
    %17 = vector.load %arg2[%16, %c0_12, %c0_13] : memref<8x8x16xf32, #tpu.memory_space<vmem>>, vector<1x8x16xf32>
    %18 = vector.shape_cast %17 : vector<1x8x16xf32> to vector<8x16xf32>
    %cst_14 = arith.constant dense<0.000000e+00> : vector<8x32xf32>
    %19 = tpu.matmul %18, %3, %cst_14 {dimension_numbers = #tpu.dot_dimension_numbers<[1], [0], [0], [1], [0, 0, 1, 1], [], []>} : vector<8x16xf32>, vector<16x32xf32>, vector<8x32xf32> -> vector<8x32xf32>
    %20 = vector.broadcast %4 : vector<1x32xf32> to vector<8x32xf32>
    %21 = arith.addf %19, %20 : vector<8x32xf32>
    %cst_15 = arith.constant dense<0.000000e+00> : vector<8x32xf32>
    %22 = tpu.matmul %15, %5, %cst_15 {dimension_numbers = #tpu.dot_dimension_numbers<[1], [0], [0], [1], [0, 0, 1, 1], [], []>} : vector<8x32xf32>, vector<32x32xf32>, vector<8x32xf32> -> vector<8x32xf32>
    %23 = arith.addf %21, %22 : vector<8x32xf32>
    %24 = math.tanh %23 : vector<8x32xf32>
    %c2_i32 = arith.constant 2 : i32
    %25 = arith.index_cast %c2_i32 : i32 to index
    %c0_16 = arith.constant 0 : index
    %c0_17 = arith.constant 0 : index
    %26 = vector.load %arg2[%25, %c0_16, %c0_17] : memref<8x8x16xf32, #tpu.memory_space<vmem>>, vector<1x8x16xf32>
    %27 = vector.shape_cast %26 : vector<1x8x16xf32> to vector<8x16xf32>
    %cst_18 = arith.constant dense<0.000000e+00> : vector<8x32xf32>
    %28 = tpu.matmul %27, %3, %cst_18 {dimension_numbers = #tpu.dot_dimension_numbers<[1], [0], [0], [1], [0, 0, 1, 1], [], []>} : vector<8x16xf32>, vector<16x32xf32>, vector<8x32xf32> -> vector<8x32xf32>
    %29 = vector.broadcast %4 : vector<1x32xf32> to vector<8x32xf32>
    %30 = arith.addf %28, %29 : vector<8x32xf32>
    %cst_19 = arith.constant dense<0.000000e+00> : vector<8x32xf32>
    %31 = tpu.matmul %24, %5, %cst_19 {dimension_numbers = #tpu.dot_dimension_numbers<[1], [0], [0], [1], [0, 0, 1, 1], [], []>} : vector<8x32xf32>, vector<32x32xf32>, vector<8x32xf32> -> vector<8x32xf32>
    %32 = arith.addf %30, %31 : vector<8x32xf32>
    %33 = math.tanh %32 : vector<8x32xf32>
    %c3_i32 = arith.constant 3 : i32
    %34 = arith.index_cast %c3_i32 : i32 to index
    %c0_20 = arith.constant 0 : index
    %c0_21 = arith.constant 0 : index
    %35 = vector.load %arg2[%34, %c0_20, %c0_21] : memref<8x8x16xf32, #tpu.memory_space<vmem>>, vector<1x8x16xf32>
    %36 = vector.shape_cast %35 : vector<1x8x16xf32> to vector<8x16xf32>
    %cst_22 = arith.constant dense<0.000000e+00> : vector<8x32xf32>
    %37 = tpu.matmul %36, %3, %cst_22 {dimension_numbers = #tpu.dot_dimension_numbers<[1], [0], [0], [1], [0, 0, 1, 1], [], []>} : vector<8x16xf32>, vector<16x32xf32>, vector<8x32xf32> -> vector<8x32xf32>
    %38 = vector.broadcast %4 : vector<1x32xf32> to vector<8x32xf32>
    %39 = arith.addf %37, %38 : vector<8x32xf32>
    %cst_23 = arith.constant dense<0.000000e+00> : vector<8x32xf32>
    %40 = tpu.matmul %33, %5, %cst_23 {dimension_numbers = #tpu.dot_dimension_numbers<[1], [0], [0], [1], [0, 0, 1, 1], [], []>} : vector<8x32xf32>, vector<32x32xf32>, vector<8x32xf32> -> vector<8x32xf32>
    %41 = arith.addf %39, %40 : vector<8x32xf32>
    %42 = math.tanh %41 : vector<8x32xf32>
    %c4_i32 = arith.constant 4 : i32
    %43 = arith.index_cast %c4_i32 : i32 to index
    %c0_24 = arith.constant 0 : index
    %c0_25 = arith.constant 0 : index
    %44 = vector.load %arg2[%43, %c0_24, %c0_25] : memref<8x8x16xf32, #tpu.memory_space<vmem>>, vector<1x8x16xf32>
    %45 = vector.shape_cast %44 : vector<1x8x16xf32> to vector<8x16xf32>
    %cst_26 = arith.constant dense<0.000000e+00> : vector<8x32xf32>
    %46 = tpu.matmul %45, %3, %cst_26 {dimension_numbers = #tpu.dot_dimension_numbers<[1], [0], [0], [1], [0, 0, 1, 1], [], []>} : vector<8x16xf32>, vector<16x32xf32>, vector<8x32xf32> -> vector<8x32xf32>
    %47 = vector.broadcast %4 : vector<1x32xf32> to vector<8x32xf32>
    %48 = arith.addf %46, %47 : vector<8x32xf32>
    %cst_27 = arith.constant dense<0.000000e+00> : vector<8x32xf32>
    %49 = tpu.matmul %42, %5, %cst_27 {dimension_numbers = #tpu.dot_dimension_numbers<[1], [0], [0], [1], [0, 0, 1, 1], [], []>} : vector<8x32xf32>, vector<32x32xf32>, vector<8x32xf32> -> vector<8x32xf32>
    %50 = arith.addf %48, %49 : vector<8x32xf32>
    %51 = math.tanh %50 : vector<8x32xf32>
    %c5_i32 = arith.constant 5 : i32
    %52 = arith.index_cast %c5_i32 : i32 to index
    %c0_28 = arith.constant 0 : index
    %c0_29 = arith.constant 0 : index
    %53 = vector.load %arg2[%52, %c0_28, %c0_29] : memref<8x8x16xf32, #tpu.memory_space<vmem>>, vector<1x8x16xf32>
    %54 = vector.shape_cast %53 : vector<1x8x16xf32> to vector<8x16xf32>
    %cst_30 = arith.constant dense<0.000000e+00> : vector<8x32xf32>
    %55 = tpu.matmul %54, %3, %cst_30 {dimension_numbers = #tpu.dot_dimension_numbers<[1], [0], [0], [1], [0, 0, 1, 1], [], []>} : vector<8x16xf32>, vector<16x32xf32>, vector<8x32xf32> -> vector<8x32xf32>
    %56 = vector.broadcast %4 : vector<1x32xf32> to vector<8x32xf32>
    %57 = arith.addf %55, %56 : vector<8x32xf32>
    %cst_31 = arith.constant dense<0.000000e+00> : vector<8x32xf32>
    %58 = tpu.matmul %51, %5, %cst_31 {dimension_numbers = #tpu.dot_dimension_numbers<[1], [0], [0], [1], [0, 0, 1, 1], [], []>} : vector<8x32xf32>, vector<32x32xf32>, vector<8x32xf32> -> vector<8x32xf32>
    %59 = arith.addf %57, %58 : vector<8x32xf32>
    %60 = math.tanh %59 : vector<8x32xf32>
    %c6_i32 = arith.constant 6 : i32
    %61 = arith.index_cast %c6_i32 : i32 to index
    %c0_32 = arith.constant 0 : index
    %c0_33 = arith.constant 0 : index
    %62 = vector.load %arg2[%61, %c0_32, %c0_33] : memref<8x8x16xf32, #tpu.memory_space<vmem>>, vector<1x8x16xf32>
    %63 = vector.shape_cast %62 : vector<1x8x16xf32> to vector<8x16xf32>
    %cst_34 = arith.constant dense<0.000000e+00> : vector<8x32xf32>
    %64 = tpu.matmul %63, %3, %cst_34 {dimension_numbers = #tpu.dot_dimension_numbers<[1], [0], [0], [1], [0, 0, 1, 1], [], []>} : vector<8x16xf32>, vector<16x32xf32>, vector<8x32xf32> -> vector<8x32xf32>
    %65 = vector.broadcast %4 : vector<1x32xf32> to vector<8x32xf32>
    %66 = arith.addf %64, %65 : vector<8x32xf32>
    %cst_35 = arith.constant dense<0.000000e+00> : vector<8x32xf32>
    %67 = tpu.matmul %60, %5, %cst_35 {dimension_numbers = #tpu.dot_dimension_numbers<[1], [0], [0], [1], [0, 0, 1, 1], [], []>} : vector<8x32xf32>, vector<32x32xf32>, vector<8x32xf32> -> vector<8x32xf32>
    %68 = arith.addf %66, %67 : vector<8x32xf32>
    %69 = math.tanh %68 : vector<8x32xf32>
    %c7_i32 = arith.constant 7 : i32
    %70 = arith.index_cast %c7_i32 : i32 to index
    %c0_36 = arith.constant 0 : index
    %c0_37 = arith.constant 0 : index
    %71 = vector.load %arg2[%70, %c0_36, %c0_37] : memref<8x8x16xf32, #tpu.memory_space<vmem>>, vector<1x8x16xf32>
    %72 = vector.shape_cast %71 : vector<1x8x16xf32> to vector<8x16xf32>
    %cst_38 = arith.constant dense<0.000000e+00> : vector<8x32xf32>
    %73 = tpu.matmul %72, %3, %cst_38 {dimension_numbers = #tpu.dot_dimension_numbers<[1], [0], [0], [1], [0, 0, 1, 1], [], []>} : vector<8x16xf32>, vector<16x32xf32>, vector<8x32xf32> -> vector<8x32xf32>
    %74 = vector.broadcast %4 : vector<1x32xf32> to vector<8x32xf32>
    %75 = arith.addf %73, %74 : vector<8x32xf32>
    %cst_39 = arith.constant dense<0.000000e+00> : vector<8x32xf32>
    %76 = tpu.matmul %69, %5, %cst_39 {dimension_numbers = #tpu.dot_dimension_numbers<[1], [0], [0], [1], [0, 0, 1, 1], [], []>} : vector<8x32xf32>, vector<32x32xf32>, vector<8x32xf32> -> vector<8x32xf32>
    %77 = arith.addf %75, %76 : vector<8x32xf32>
    %78 = math.tanh %77 : vector<8x32xf32>
    %c8_i32 = arith.constant 8 : i32
    %c0_40 = arith.constant 0 : index
    %c0_41 = arith.constant 0 : index
    %79 = vector.load %arg9[%c0_40, %c0_41] : memref<8x32xf32, #tpu.memory_space<vmem>>, vector<8x32xf32>
    tpu.vector_store %arg9[%c0_40, %c0_41], %78 {strides = array<i32>} : memref<8x32xf32, #tpu.memory_space<vmem>>, vector<8x32xf32>,
    %c0_i32_42 = arith.constant 0 : i32
    %80 = arith.cmpi eq, %arg1, %c0_i32_42 : i32
    %81 = arith.extui %80 : i1 to i32
    %c0_i32_43 = arith.constant 0 : i32
    %82 = arith.cmpi ne, %81, %c0_i32_43 : i32
    scf.if %82 {
      %c0_44 = arith.constant 0 : index
      %c0_45 = arith.constant 0 : index
      %83 = vector.load %arg6[%c0_44, %c0_45] : memref<32x8xf32, #tpu.memory_space<vmem>>, vector<32x8xf32>
      %cst_46 = arith.constant dense<0.000000e+00> : vector<8x8xf32>
      %84 = tpu.matmul %78, %83, %cst_46 {dimension_numbers = #tpu.dot_dimension_numbers<[1], [0], [0], [1], [0, 0, 1, 1], [], []>} : vector<8x32xf32>, vector<32x8xf32>, vector<8x8xf32> -> vector<8x8xf32>
      %c0_47 = arith.constant 0 : index
      %c0_48 = arith.constant 0 : index
      %85 = vector.load %arg7[%c0_47, %c0_48] : memref<1x8xf32, #tpu.memory_space<vmem>>, vector<1x8xf32>
      %86 = vector.broadcast %85 : vector<1x8xf32> to vector<8x8xf32>
      %87 = arith.addf %84, %86 : vector<8x8xf32>
      %c0_49 = arith.constant 0 : index
      %c0_50 = arith.constant 0 : index
      %88 = vector.load %arg8[%c0_49, %c0_50] : memref<8x8xf32, #tpu.memory_space<vmem>>, vector<8x8xf32>
      tpu.vector_store %arg8[%c0_49, %c0_50], %87 {strides = array<i32>} : memref<8x8xf32, #tpu.memory_space<vmem>>, vector<8x8xf32>,
    } else {
    }
    return
  }
  func.func @transform_0(%arg0: i32, %arg1: i32) -> (i32, i32, i32) {
    %c0_i32 = arith.constant 0 : i32
    %c0_i32_0 = arith.constant 0 : i32
    return %arg1, %arg0, %c0_i32 : i32, i32, i32
  }
  func.func @transform_1(%arg0: i32, %arg1: i32) -> (i32, i32) {
    %c0_i32 = arith.constant 0 : i32
    %c0_i32_0 = arith.constant 0 : i32
    %c0_i32_1 = arith.constant 0 : i32
    return %c0_i32, %c0_i32_0 : i32, i32
  }
  func.func @transform_2(%arg0: i32, %arg1: i32) -> (i32, i32) {
    %c0_i32 = arith.constant 0 : i32
    %c0_i32_0 = arith.constant 0 : i32
    %c0_i32_1 = arith.constant 0 : i32
    return %c0_i32, %c0_i32_0 : i32, i32
  }
  func.func @transform_3(%arg0: i32, %arg1: i32) -> (i32, i32) {
    %c0_i32 = arith.constant 0 : i32
    %c0_i32_0 = arith.constant 0 : i32
    %c0_i32_1 = arith.constant 0 : i32
    return %c0_i32, %c0_i32_0 : i32, i32
  }
  func.func @transform_4(%arg0: i32, %arg1: i32) -> (i32, i32) {
    %c0_i32 = arith.constant 0 : i32
    %c0_i32_0 = arith.constant 0 : i32
    %c0_i32_1 = arith.constant 0 : i32
    return %c0_i32, %c0_i32_0 : i32, i32
  }
  func.func @transform_5(%arg0: i32, %arg1: i32) -> (i32, i32) {
    %c0_i32 = arith.constant 0 : i32
    %c0_i32_0 = arith.constant 0 : i32
    %c0_i32_1 = arith.constant 0 : i32
    return %c0_i32, %c0_i32_0 : i32, i32
  }
  func.func @transform_6(%arg0: i32, %arg1: i32) -> (i32, i32) {
    %c0_i32 = arith.constant 0 : i32
    %c0_i32_0 = arith.constant 0 : i32
    return %arg0, %c0_i32 : i32, i32
  }
}

</mosaic_0001>

<bundles_post_ra>
// kernel: tpu_custom_call.1
= control target key start
LH: loop header
LB: loop body
LE: loop exit
PB: predicated region body
PF: predicated region fallthrough
CT: control target
= control target key end

     0   :  { %11 = vsyncpa [#allocation4], 0  ;;  %s2001_s0 = inlined_call_operand.hbm [shape: f32[8,8,16], index: 0, kind: input, shape index: {}]   ;;  %s2002_s1 = inlined_call_operand.vmem [shape: f32[16,32], index: 1, kind: input, shape index: {}]   ;;  %s2003_s2 = inlined_call_operand.vmem [shape: f32[1,32], index: 2, kind: input, shape index: {}]   ;;  %s2004_s3 = inlined_call_operand.vmem [shape: f32[32,32], index: 3, kind: input, shape index: {}]   ;;  %s2005_s4 = inlined_call_operand.vmem [shape: f32[32,8], index: 4, kind: input, shape index: {}]   ;;  %s2006_s5 = inlined_call_operand.vmem [shape: f32[1,8], index: 5, kind: input, shape index: {}]   ;;  %s2007_s6 = inlined_call_operand.hbm [shape: f32[8,8], index: 6, kind: output, shape index: {}]  }
   0x1   :  { %12 = vsyncpa [#allocation5], 0  ;;  %s1779_s21 = smov [#allocation3]   ;;  %s1731_s25 = scalar_lea.hbm %s2001_s0, 1024 }
   0x2   :  { %s18_s22 = sshll.u32 %s1779_s21, 4  ;;  %p1732_p0 = scmp.ne.s32.totalorder %s2001_s0, %s1731_s25  ;;  %s19_s22 = int_to_ptr.vmem [resolvable:$true] %s18_s22 }
   0x3   :  { %p1735_p1 = scmp.lt.u32.totalorder %s1731_s25, %s2001_s0 }
   0x5   :  { %p1737_p2 = pnand %p1735_p1, %p1732_p0 }
   0x7   :  { %1740 = shalt.err (!%p1737_p2)
}
   0x8   :  { %s1741_s30 = scalar_lea.vmem %s19_s22, 1024  ;;  %p1746_p4 = scmp.lt.s32.totalorder %s19_s22, %s19_s22 }
   0x9   :  { %p1742_p3 = scmp.ne.s32.totalorder %s19_s22, %s1741_s30  ;;  %p1747_p5 = scmp.lt.s32.totalorder %s1741_s30, %s1741_s30 }
   0xb   :  { %p1748_p6 = por %p1747_p5, %p1746_p4 }
   0xd   :  { %p1749_p7 = pnand %p1748_p6, %p1742_p3 }
   0xf   :  { %1752 = shalt.err (!%p1749_p7)
}
  0x10   :  { %s1780_s7 = smov 128   ;;  %s1781_s8 = smov 8  }
  0x11   :  { %24 = dma.hbm_to_vmem [thread:$0]  %s2001_s0, 1024, %s19_s22, [#allocation4], %s1780_s7, %s1780_s7, %s1781_s8  }
  0x12   :  { %1775 = dma.done.wait [#allocation4], 1024  }
  0x13   :  { %1776 = vsyncadd [#allocation4], 4294966272  ;;  %v1782_v0 = vmov 0.0|0.0   ;;  %vm42_vm0 = vcmask 261120   ;;  %vm1783_vm1 = vmmov 0   ;;  %v1784_v1 = vmov 0.0  }
  0x14   :  { %1610 = vmatprep.subr.bf16.mxu0 %v1782_v0  ;;  %1607 = vmatprep.subr.bf16.mxu1 %v1782_v0  ;;  %43 = vst.msk [vmem:[#allocation2] sm:$0xff] %vm42_vm0, %v1784_v1  ;;  %v47_v2 = vld [vmem:[%s2004_s3] sm:$0xff]  ;;  %v48_v3 = vld [vmem:[%s2004_s3 + $0x8] sm:$0xff]  ;;  %v49_v7 = vld [vmem:[%s2004_s3 + $0x10] sm:$0xff]  ;;  %vm59_vm2 = vcmask 130048   ;;  %s1785_s7 = smov [#allocation6]  }
  0x15   :  { %1456 = vmatprep.mubr.msk.f32.mxu1 %vm1783_vm1, %v1784_v1  ;;  %1467 = vmatprep.mubr.msk.f32.mxu0 %vm1783_vm1, %v1784_v1  ;;  %v44_v4 = vld [vmem:[%s2002_s1] sm:$0xff]  ;;  %v1850_v5 = vpack.c.bf16 %v48_v3, %v47_v2  ;;  %v45_v6 = vld [vmem:[%s2002_s1 + $0x8] sm:$0xff]  ;;  %v50_v9 = vld [vmem:[%s2004_s3 + $0x18] sm:$0xff]  ;;  %s1355_s8 = sshll.u32 %s1785_s7, 4  ;;  %vm1347_vm3 = vcmask 64512   ;;  %s1356_s8 = int_to_ptr.vmem [resolvable:$true] %s1355_s8 }
  0x16   :  { %v1858_v8 = vpack.c.bf16 %v45_v6, %v44_v4  ;;  %v1864_v10 = vpack.c.bf16 %v50_v9, %v49_v7  ;;  %v52_v11 = vld [vmem:[#allocation3] sm:$0xff]  ;;  %v210_v13 = vld [vmem:[#allocation3 + $0x8] sm:$0xff]  ;;  %v1891_v14 = vld [vmem:[%s2003_s2] ss:$0 sm:$0xff]  ;;  %p1758_p9 = scmp.lt.s32.totalorder %s1356_s8, %s1356_s8 }
  0x17   :  { %1612 = vmatpush3.bf16.msra.mxu0 %v1850_v5  ;;  %v360_v22 = vld [vmem:[#allocation3 + $0x10] sm:$0xff]  ;;  %v510_v27 = vld [vmem:[#allocation3 + $0x18] sm:$0xff]  ;;  %v660_v32 = vld [vmem:[#allocation3 + $0x20] sm:$0xff] }
  0x18   :  { %1609 = vmatpush3.bf16.msra.mxu1 %v1858_v8  ;;  %1613 = vmatprep.subr.bf16.mxu0 %v1782_v0  ;;  %v810_v37 = vld [vmem:[#allocation3 + $0x28] sm:$0xff]  ;;  %v960_v42 = vld [vmem:[#allocation3 + $0x30] sm:$0xff]  ;;  %v1110_v47 = vld [vmem:[#allocation3 + $0x38] sm:$0xff] }
  0x19   :  { %1616 = vmatprep.subr.bf16.mxu1 %v1782_v0  ;;  %v1263_v52 = vld [vmem:[%s2005_s4] sm:$0xff]  ;;  %v1264_v53 = vld [vmem:[%s2005_s4 + $0x8] sm:$0xff]  ;;  %v1265_v55 = vld [vmem:[%s2005_s4 + $0x10] sm:$0xff] }
  0x1a   :  { %v1680_v54 = vpack.c.bf16 %v1264_v53, %v1263_v52  ;;  %v1266_v56 = vld [vmem:[%s2005_s4 + $0x18] sm:$0xff]  ;;  %v1381_v62 = vld [vmem:[%s2006_s5] ss:$0 sm:$0xff]  ;;  %s1753_s4 = scalar_lea.vmem %s1356_s8, 128 }
  0x1b   :  { %1457 = vmatmul.mubr.msk.f32.vlgmr.msra.gmra.mrb[0].mxu1 %vm59_vm2, %v52_v11  ;;  %1615 = vmatpush3.bf16.msra.mxu0 %v1864_v10  ;;  %v51_v12 = vld [vmem:[#allocation2] sm:$0xff]  ;;  %v1683_v57 = vpack.c.bf16 %v1266_v56, %v1265_v55  ;;  %p1754_p8 = scmp.ne.s32.totalorder %s1356_s8, %s1753_s4  ;;  %p1759_p10 = scmp.lt.s32.totalorder %s1753_s4, %s1753_s4 }
  0x1c   :  { %1618 = vmatpush3.bf16.msra.mxu1 %v1858_v8  ;;  %1474 = vmatprep.mubr.msk.f32.mxu1 %vm1783_vm1, %v1784_v1 }
  0x1d   :  { %1619 = vmatprep.subr.bf16.mxu1 %v1782_v0  ;;  %1625 = vmatprep.subr.bf16.mxu0 %v1782_v0  ;;  %p1760_p11 = por %p1759_p10, %p1758_p9 }
  0x1e   :  { %1468 = vmatmul.mubr.msk.f32.vlgmr.msra.gmra.mrb[0].mxu0 %vm42_vm0, %v51_v12 }
  0x1f   :  { %1627 = vmatpush3.bf16.msra.mxu0 %v1858_v8  ;;  %1492 = vmatprep.mubr.msk.f32.mxu0 %vm1783_vm1, %v1784_v1  ;;  %p1761_p12 = pnand %p1760_p11, %p1754_p8 }
  0x20   :  { %1628 = vmatprep.subr.bf16.mxu0 %v1782_v0  ;;  %1475 = vmatmul.mubr.msk.f32.vlgmr.msra.gmra.mrb[2].mxu1 %vm59_vm2, %v210_v13 }
  0x21   :  { %1621 = vmatpush3.bf16.msra.mxu1 %v1850_v5  ;;  %1485 = vmatprep.mubr.msk.f32.mxu1 %vm1783_vm1, %v1784_v1 }
  0x22   :  { %1622 = vmatprep.subr.bf16.mxu1 %v1782_v0  ;;  %1493 = vmatmul.mubr.msk.f32.vlgmr.msra.gmra.mrb[2].mxu0 %vm59_vm2, %v360_v22 }
  0x23   :  { %1630 = vmatpush3.bf16.msra.mxu0 %v1850_v5  ;;  %1503 = vmatprep.mubr.msk.f32.mxu0 %vm1783_vm1, %v1784_v1 }
  0x24   :  { %1631 = vmatprep.subr.bf16.mxu0 %v1782_v0 }
  0x25   :  { %1624 = vmatpush3.bf16.msra.mxu1 %v1864_v10 }
  0x26   :  { %1634 = vmatprep.subr.bf16.mxu1 %v1782_v0 }
  0x27   :  { %1633 = vmatpush3.bf16.msra.mxu0 %v1864_v10 }
  0x28   :  { %1643 = vmatprep.subr.bf16.mxu0 %v1782_v0 }
  0xee   :  { %v129_v15 = vpop.f32.mrb[0].mxu1 }
  0xef   :  { %v130_v16 = vadd.f32 %v1891_v14, %v129_v15  ;;  %v1458_v17 = vpop.f32.mrb[1].mxu1 }
  0xf1   :  { %v203_v18 = vpop.f32.mrb[0].mxu0 }
  0xf2   :  { %v207_v19 = vadd.f32 %v203_v18, %v130_v16  ;;  %v1469_v20 = vpop.f32.mrb[1].mxu0 }
  0xf4   :  { %1715 = vtanh.f32 %v207_v19 }
  0xfe   :  { %v1716_v21 = vpop.eup %1715 }
  0xff   :  { %1486 = vmatmul.mubr.msk.f32.vlgmr.msra.gmra.mrb[2].mxu1 %vm42_vm0, %v1716_v21 }
 0x100   :  { %1636 = vmatpush3.bf16.msra.mxu1 %v1858_v8  ;;  %1510 = vmatprep.mubr.msk.f32.mxu1 %vm1783_vm1, %v1784_v1 }
 0x101   :  { %1637 = vmatprep.subr.bf16.mxu1 %v1782_v0 }
 0x103   :  { %1511 = vmatmul.mubr.msk.f32.vlgmr.msra.gmra.mrb[4].mxu1 %vm59_vm2, %v510_v27 }
 0x104   :  { %1639 = vmatpush3.bf16.msra.mxu1 %v1850_v5  ;;  %1521 = vmatprep.mubr.msk.f32.mxu1 %vm1783_vm1, %v1784_v1 }
 0x105   :  { %1640 = vmatprep.subr.bf16.mxu1 %v1782_v0 }
 0x108   :  { %1642 = vmatpush3.bf16.msra.mxu1 %v1864_v10 }
 0x109   :  { %1652 = vmatprep.subr.bf16.mxu1 %v1782_v0 }
 0x1d2   :  { %v353_v23 = vpop.f32.mrb[2].mxu1 }
 0x1d3   :  { %v1687_v24 = vadd.f32 %v1891_v14, %v353_v23  ;;  %v1487_v25 = vpop.f32.mrb[3].mxu1 }
 0x1d5   :  { %1717 = vtanh.f32 %v1687_v24 }
 0x1df   :  { %v1718_v26 = vpop.eup %1717 }
 0x1e0   :  { %1504 = vmatmul.mubr.msk.f32.vlgmr.msra.gmra.mrb[2].mxu0 %vm42_vm0, %v1718_v26 }
 0x1e1   :  { %1645 = vmatpush3.bf16.msra.mxu0 %v1858_v8  ;;  %1528 = vmatprep.mubr.msk.f32.mxu0 %vm1783_vm1, %v1784_v1 }
 0x1e2   :  { %1646 = vmatprep.subr.bf16.mxu0 %v1782_v0 }
 0x1e4   :  { %1529 = vmatmul.mubr.msk.f32.vlgmr.msra.gmra.mrb[4].mxu0 %vm59_vm2, %v660_v32 }
 0x1e5   :  { %1648 = vmatpush3.bf16.msra.mxu0 %v1850_v5  ;;  %1539 = vmatprep.mubr.msk.f32.mxu0 %vm1783_vm1, %v1784_v1 }
 0x1e6   :  { %1649 = vmatprep.subr.bf16.mxu0 %v1782_v0 }
 0x1e9   :  { %1651 = vmatpush3.bf16.msra.mxu0 %v1864_v10 }
 0x1ea   :  { %1661 = vmatprep.subr.bf16.mxu0 %v1782_v0 }
 0x2b3   :  { %v503_v28 = vpop.f32.mrb[2].mxu0 }
 0x2b4   :  { %v1688_v29 = vadd.f32 %v1891_v14, %v503_v28  ;;  %v1505_v30 = vpop.f32.mrb[3].mxu0 }
 0x2b6   :  { %1719 = vtanh.f32 %v1688_v29 }
 0x2c0   :  { %v1720_v31 = vpop.eup %1719 }
 0x2c1   :  { %1522 = vmatmul.mubr.msk.f32.vlgmr.msra.gmra.mrb[4].mxu1 %vm42_vm0, %v1720_v31 }
 0x2c2   :  { %1654 = vmatpush3.bf16.msra.mxu1 %v1858_v8  ;;  %1546 = vmatprep.mubr.msk.f32.mxu1 %vm1783_vm1, %v1784_v1 }
 0x2c3   :  { %1655 = vmatprep.subr.bf16.mxu1 %v1782_v0 }
 0x2c5   :  { %1547 = vmatmul.mubr.msk.f32.vlgmr.msra.gmra.mrb[6].mxu1 %vm59_vm2, %v810_v37 }
 0x2c6   :  { %1657 = vmatpush3.bf16.msra.mxu1 %v1850_v5  ;;  %1557 = vmatprep.mubr.msk.f32.mxu1 %vm1783_vm1, %v1784_v1 }
 0x2c7   :  { %1658 = vmatprep.subr.bf16.mxu1 %v1782_v0 }
 0x2ca   :  { %1660 = vmatpush3.bf16.msra.mxu1 %v1864_v10 }
 0x2cb   :  { %1670 = vmatprep.subr.bf16.mxu1 %v1782_v0 }
 0x394   :  { %v653_v33 = vpop.f32.mrb[4].mxu1 }
 0x395   :  { %v1689_v34 = vadd.f32 %v1891_v14, %v653_v33  ;;  %v1523_v35 = vpop.f32.mrb[5].mxu1 }
 0x397   :  { %1721 = vtanh.f32 %v1689_v34 }
 0x3a1   :  { %v1722_v36 = vpop.eup %1721 }
 0x3a2   :  { %1540 = vmatmul.mubr.msk.f32.vlgmr.msra.gmra.mrb[4].mxu0 %vm42_vm0, %v1722_v36 }
 0x3a3   :  { %1663 = vmatpush3.bf16.msra.mxu0 %v1858_v8  ;;  %1564 = vmatprep.mubr.msk.f32.mxu0 %vm1783_vm1, %v1784_v1 }
 0x3a4   :  { %1664 = vmatprep.subr.bf16.mxu0 %v1782_v0 }
 0x3a6   :  { %1565 = vmatmul.mubr.msk.f32.vlgmr.msra.gmra.mrb[6].mxu0 %vm59_vm2, %v960_v42 }
 0x3a7   :  { %1666 = vmatpush3.bf16.msra.mxu0 %v1850_v5  ;;  %1575 = vmatprep.mubr.msk.f32.mxu0 %vm1783_vm1, %v1784_v1 }
 0x3a8   :  { %1667 = vmatprep.subr.bf16.mxu0 %v1782_v0 }
 0x3ab   :  { %1669 = vmatpush3.bf16.msra.mxu0 %v1864_v10 }
 0x3ac   :  { %1679 = vmatprep.subr.bf16.mxu0 %v1782_v0 }
 0x475   :  { %v803_v38 = vpop.f32.mrb[4].mxu0 }
 0x476   :  { %v1690_v39 = vadd.f32 %v1891_v14, %v803_v38  ;;  %v1541_v40 = vpop.f32.mrb[5].mxu0 }
 0x478   :  { %1723 = vtanh.f32 %v1690_v39 }
 0x482   :  { %v1724_v41 = vpop.eup %1723 }
 0x483   :  { %1558 = vmatmul.mubr.msk.f32.vlgmr.msra.gmra.mrb[6].mxu1 %vm42_vm0, %v1724_v41 }
 0x484   :  { %1672 = vmatpush3.bf16.msra.mxu1 %v1858_v8  ;;  %1582 = vmatprep.mubr.msk.f32.mxu1 %vm1783_vm1, %v1784_v1 }
 0x485   :  { %1673 = vmatprep.subr.bf16.mxu1 %v1782_v0 }
 0x487   :  { %1583 = vmatmul.mubr.msk.f32.vlgmr.msra.gmra.mrb[8].mxu1 %vm59_vm2, %v1110_v47 }
 0x488   :  { %1675 = vmatpush3.bf16.msra.mxu1 %v1850_v5  ;;  %1593 = vmatprep.mubr.msk.f32.mxu1 %vm1783_vm1, %v1784_v1 }
 0x489   :  { %1676 = vmatprep.subr.bf16.mxu1 %v1782_v0 }
 0x48c   :  { %1678 = vmatpush3.bf16.msra.mxu1 %v1864_v10 }
 0x556   :  { %v953_v43 = vpop.f32.mrb[6].mxu1 }
 0x557   :  { %v1691_v44 = vadd.f32 %v1891_v14, %v953_v43  ;;  %v1559_v45 = vpop.f32.mrb[7].mxu1 }
 0x559   :  { %1725 = vtanh.f32 %v1691_v44 }
 0x563   :  { %v1726_v46 = vpop.eup %1725 }
 0x564   :  { %1576 = vmatmul.mubr.msk.f32.vlgmr.msra.gmra.mrb[6].mxu0 %vm42_vm0, %v1726_v46 }
 0x565   :  { %1604 = vmatprep.mubr.msk.f32.mxu0 %vm1783_vm1, %v1784_v1  ;;  %1681 = vmatpush3.bf16.msra.mxu0 %v1680_v54 }
 0x566   :  { %1682 = vmatprep.subr.bf16.mxu0 %v1782_v0 }
 0x569   :  { %1684 = vmatpush3.bf16.msra.mxu0 %v1683_v57 }
 0x637   :  { %v1103_v48 = vpop.f32.mrb[6].mxu0 }
 0x638   :  { %v1692_v49 = vadd.f32 %v1891_v14, %v1103_v48  ;;  %v1577_v50 = vpop.f32.mrb[7].mxu0 }
 0x63a   :  { %1727 = vtanh.f32 %v1692_v49 }
 0x644   :  { %v1728_v51 = vpop.eup %1727 }
 0x645   :  { %1594 = vmatmul.mubr.msk.f32.vlgmr.msra.gmra.mrb[8].mxu1 %vm42_vm0, %v1728_v51 }
 0x718   :  { %v1253_v58 = vpop.f32.mrb[8].mxu1 }
 0x719   :  { %v1693_v59 = vadd.f32 %v1891_v14, %v1253_v58  ;;  %v1595_v60 = vpop.f32.mrb[9].mxu1 }
 0x71b   :  { %1729 = vtanh.f32 %v1693_v59 }
 0x725   :  { %v1730_v61 = vpop.eup %1729 }
 0x726   :  { %1259 = vst.msk [vmem:[#allocation2] sm:$0xff] %vm42_vm0, %v1730_v61  ;;  %1605 = vmatmul.mubr.msk.f32.vlgmr.msra.gmra.mrb[8].mxu0 %vm42_vm0, %v1730_v61 }
 0x7f9   :  { %v1343_v63 = vpop.f32.mrb[8].mxu0 }
 0x7fa   :  { %v1344_v0 = vadd.f32 %v1381_v62, %v1343_v63  ;;  %v1606_v1 = vpop.f32.mrb[9].mxu0 }
 0x7fc   :  { %1348 = vst.msk [vmem:[#allocation6] sm:$0xff] %vm1347_vm3, %v1344_v0 }
 0x7fd   :  { %1764 = shalt.err (!%p1761_p12)
}
 0x7fe   :  { %s1765_s0 = scalar_lea.hbm %s2007_s6, 128 }
 0x7ff   :  { %p1766_p13 = scmp.ne.s32.totalorder %s2007_s6, %s1765_s0  ;;  %p1769_p0 = scmp.lt.u32.totalorder %s1765_s0, %s2007_s6 }
 0x801   :  { %p1771_p1 = pnand %p1769_p0, %p1766_p13 }
 0x803   :  { %1774 = shalt.err (!%p1771_p1)
}
 0x804   :  { %1358 = dma.vmem_to_hbm [thread:$0]  %s1356_s8, 128, %s2007_s6, [#allocation5]  }
 0x805   :  { %1777 = dma.done.wait [#allocation5], 128  }
 0x806   :  { %1778 = vsyncadd [#allocation5], 4294967168 }
 0x807   :  { %1362 = vsyncpa [#allocation4], 1 }
 0x808   :  { %1363 = vsyncpa [#allocation5], 1 }

</bundles_post_ra>
